<compile_context>
chip_gen: v5e
topology: v5e:2x2
jax: 0.10.0
libtpu: 0.0.40
codegen_flags: <defaults>
</compile_context>

<pallas_src>
import jax
import jax.numpy as jnp
from jax import lax
from jax.experimental import pallas as pl
from jax.experimental.pallas import tpu as pltpu

LANE = 128            # TPU lane width
OBS_DIM = 4           # CartPole-v1 observation_space.shape[0]
N_ACTIONS = 2         # CartPole-v1 action_space.n
HS = 32               # hidden size
VALUE_LANE = N_ACTIONS  # critic value sits in the lane right after the logits
X_LANES = 8           # thin input slab width (obs padded 4 -> 8 sublane-friendly lanes)
MAX_TB = 1024         # batch tile rows (1024 ~86% of HBM roofline per reference data)

# Packed parameter slab layout (single [272, 128] f32 array, VMEM-resident):
W0_OFF = 0            # rows 0:8     layer-1 weights  [obs(4, zero-padded to 8) x 128]
W2_OFF = W0_OFF + X_LANES       # rows 8:136   layer-2 weights  (block-diagonal 32+32)
W3_OFF = W2_OFF + LANE          # rows 136:264 layer-3 weights  (logits lanes 0-1, value lane 2)
B_OFF = W3_OFF + LANE           # rows 264:267 biases b1, b2, b3 (rows 267:272 zero pad)
SLAB_ROWS = B_OFF + 8           # 272 (multiple of 8 sublanes)


def _round_up(n, m):
    return ((n + m - 1) // m) * m


def policy_net_kernel(x_ref, wb_ref, out_ref):
    """Fused actor+critic MLP on one (TB, 8) input tile -> one (TB, 128) output tile.

    Actor hidden state occupies lanes 0:32, critic hidden lanes 32:64 of the same
    activation tile (block-diagonal weights), so both heads cost 3 matmuls total.
    Output tile: lanes 0-1 = softmax probs, lane 2 = value, lanes 3+ = 0.
    """
    x = x_ref[...]                                           # [TB, 8] f32 (cols >= OBS_DIM are 0)

    w0 = wb_ref[W0_OFF:W0_OFF + X_LANES, :]                  # [8, 128]
    w2 = wb_ref[W2_OFF:W2_OFF + LANE, :]                     # [128, 128] block-diagonal
    w3 = wb_ref[W3_OFF:W3_OFF + LANE, :]                     # [128, 128]
    b1 = wb_ref[B_OFF + 0:B_OFF + 1, :]                      # [1, 128]
    b2 = wb_ref[B_OFF + 1:B_OFF + 2, :]
    b3 = wb_ref[B_OFF + 2:B_OFF + 3, :]

    h1 = jnp.maximum(jnp.dot(x, w0, preferred_element_type=jnp.float32) + b1, 0.0)
    h2 = jnp.maximum(jnp.dot(h1, w2, preferred_element_type=jnp.float32) + b2, 0.0)
    raw = jnp.dot(h2, w3, preferred_element_type=jnp.float32) + b3   # [TB, 128]

    lane = lax.broadcasted_iota(jnp.int32, raw.shape, 1)
    # Softmax over the actor logits only (lanes < N_ACTIONS); padded/value lanes -> prob 0.
    logits = jnp.where(lane < N_ACTIONS, raw, -jnp.inf)
    m = jnp.max(logits, axis=-1, keepdims=True)
    e = jnp.exp(logits - m)                                  # exp(-inf) = 0 in masked lanes
    probs = e * pl.reciprocal(jnp.sum(e, axis=-1, keepdims=True), approx=False)
    # Merge: lanes 0-1 probs, lane 2 raw value, lanes 3+ stay 0 (probs are 0 there).
    out_ref[...] = jnp.where(lane == VALUE_LANE, raw, probs)


def policy_net_apply(s, wb_slab):
    """Run the fused kernel once. Returns (probs [batch, N_ACTIONS], value [batch, 1])."""
    batch, obs_dim = s.shape
    b8 = _round_up(max(batch, 1), 8)

    tb = min(MAX_TB, b8)
    if b8 > 8:
        # Ensure >= 2 grid steps so the "parallel" batch axis can shard across
        # v7x's 2 TensorCores, while keeping tail-tile padding small.
        tb = min(tb, _round_up(-(-b8 // 2), 8))
    b_pad = _round_up(b8, tb)

    # Thin zero-padded input slab [b_pad, 8] (only ~32 B/row of wrapper traffic).
    x_pad = jnp.zeros((b_pad, X_LANES), jnp.float32).at[:batch, :obs_dim].set(s)

    grid = (b_pad // tb,)
    # Per-step VMEM: in tile tb*8*4 B + out tile tb*128*4 B, double-buffered, plus the
    # ~139 KiB resident weight slab and a few (tb,128) f32 temporaries -> well under the
    # scoped default on every generation (v5e/v6e/v7x) even at tb=1024.
    out_pad = pl.pallas_call(
        policy_net_kernel,
        out_shape=jax.ShapeDtypeStruct((b_pad, LANE), jnp.float32),
        grid=grid,
        in_specs=[
            pl.BlockSpec((tb, X_LANES), lambda i: (i, 0)),      # x: tiled over batch
            pl.BlockSpec((SLAB_ROWS, LANE), lambda i: (0, 0)),  # params: VMEM-resident
        ],
        out_specs=pl.BlockSpec((tb, LANE), lambda i: (i, 0)),   # single lane-dense output slab
        compiler_params=pltpu.CompilerParams(
            dimension_semantics=("parallel",),   # batch tiles split across TCs on v7x
        ),
    )(x_pad, wb_slab)

    probs = out_pad[:batch, :N_ACTIONS]
    value = out_pad[:batch, VALUE_LANE:VALUE_LANE + 1]
    return probs, value


def policy_net_forward(s, wb_slab):
    """PyTorch PolicyNet.forward(s): softmax(actor(s), dim=-1).

    Shares the fused kernel with get_value; if both heads are needed in one step,
    call policy_net_apply once and reuse both outputs instead.
    """
    return policy_net_apply(s, wb_slab)[0]


def policy_net_get_value(s, wb_slab):
    """PyTorch PolicyNet.get_value(s): critic(s)."""
    return policy_net_apply(s, wb_slab)[1]


def init_params(key, obs_dim=OBS_DIM, hs=HS, n_actions=N_ACTIONS):
    """PyTorch-style init U(-1/sqrt(fan_in), 1/sqrt(fan_in)); weights stored [in, out]."""
    ks = jax.random.split(key, 12)

    def lin(kw, kb, fan_in, fan_out):
        bound = 1.0 / (fan_in ** 0.5)
        w = jax.random.uniform(kw, (fan_in, fan_out), jnp.float32, -bound, bound)
        b = jax.random.uniform(kb, (fan_out,), jnp.float32, -bound, bound)
        return w, b

    actor = (*lin(ks[0], ks[1], obs_dim, hs),
             *lin(ks[2], ks[3], hs, hs),
             *lin(ks[4], ks[5], hs, n_actions))
    critic = (*lin(ks[6], ks[7], obs_dim, hs),
              *lin(ks[8], ks[9], hs, 1 * hs),
              *lin(ks[10], ks[11], hs, 1))
    return actor, critic


def pack_params(raw_params):
    """Pack all 12 tensors into one block-diagonal [272, 128] slab.

    Actor occupies hidden lanes 0:HS, critic lanes HS:2*HS; layer-3 maps the actor
    hidden to output lanes 0:N_ACTIONS (logits) and the critic hidden to lane
    VALUE_LANE (value). Everything else is zero.
    """
    (w1a, b1a, w2a, b2a, w3a, b3a), (w1c, b1c, w2c, b2c, w3c, b3c) = raw_params
    slab = jnp.zeros((SLAB_ROWS, LANE), jnp.float32)

    # Layer 1: [obs -> 2*HS lanes]
    slab = slab.at[W0_OFF:W0_OFF + OBS_DIM, 0:HS].set(w1a)
    slab = slab.at[W0_OFF:W0_OFF + OBS_DIM, HS:2 * HS].set(w1c)
    # Layer 2: block-diagonal [2*HS -> 2*HS]
    slab = slab.at[W2_OFF:W2_OFF + HS, 0:HS].set(w2a)
    slab = slab.at[W2_OFF + HS:W2_OFF + 2 * HS, HS:2 * HS].set(w2c)
    # Layer 3: actor hidden -> logit lanes 0:N_ACTIONS ; critic hidden -> value lane
    slab = slab.at[W3_OFF:W3_OFF + HS, 0:N_ACTIONS].set(w3a)
    slab = slab.at[W3_OFF + HS:W3_OFF + 2 * HS, VALUE_LANE:VALUE_LANE + 1].set(w3c)
    # Biases
    slab = slab.at[B_OFF + 0, 0:HS].set(b1a)
    slab = slab.at[B_OFF + 0, HS:2 * HS].set(b1c)
    slab = slab.at[B_OFF + 1, 0:HS].set(b2a)
    slab = slab.at[B_OFF + 1, HS:2 * HS].set(b2c)
    slab = slab.at[B_OFF + 2, 0:N_ACTIONS].set(b3a)
    slab = slab.at[B_OFF + 2, VALUE_LANE:VALUE_LANE + 1].set(b3c)
    return slab


def reference_forward(s, raw_params):
    (w1, b1, w2, b2, w3, b3), _ = raw_params
    h1 = jnp.maximum(s @ w1 + b1, 0.0)
    h2 = jnp.maximum(h1 @ w2 + b2, 0.0)
    return jax.nn.softmax(h2 @ w3 + b3, axis=-1)


def reference_get_value(s, raw_params):
    _, (w1, b1, w2, b2, w3, b3) = raw_params
    h1 = jnp.maximum(s @ w1 + b1, 0.0)
    h2 = jnp.maximum(h1 @ w2 + b2, 0.0)
    return h2 @ w3 + b3


if __name__ == "__main__":
    # CartPole-v1: obs_dim=4, n_actions=2 (gym env construction not needed; dims hardcoded)
    batch = 8
    key = jax.random.PRNGKey(0)
    k_params, k_x = jax.random.split(key)

    raw_params = init_params(k_params)
    wb_slab = pack_params(raw_params)
    s = jax.random.normal(k_x, (batch, OBS_DIM), jnp.float32)

    probs, value = policy_net_apply(s, wb_slab)
    jax.block_until_ready((probs, value))

    ref_probs = reference_forward(s, raw_params)
    ref_value = reference_get_value(s, raw_params)

    assert probs.shape == (batch, N_ACTIONS)
    assert value.shape == (batch, 1)
    assert jnp.allclose(probs, ref_probs, atol=1e-5, rtol=1e-5), "probs mismatch vs reference"
    assert jnp.allclose(jnp.sum(probs, axis=-1), 1.0, atol=1e-5), "softmax rows must sum to 1"
    assert jnp.allclose(value, ref_value, atol=1e-5, rtol=1e-5), "value mismatch vs reference"

    # Also exercise a multi-tile batch (forces grid >= 2 and tail padding path).
    s_big = jax.random.normal(k_x, (600, OBS_DIM), jnp.float32)
    probs_big, value_big = policy_net_apply(s_big, wb_slab)
    jax.block_until_ready((probs_big, value_big))
    assert jnp.allclose(probs_big, reference_forward(s_big, raw_params), atol=1e-5, rtol=1e-5)
    assert jnp.allclose(value_big, reference_get_value(s_big, raw_params), atol=1e-5, rtol=1e-5)

    # forward()/get_value() wrappers (same fused kernel) also work:
    _ = jax.block_until_ready(policy_net_forward(s, wb_slab))

    print("KERNEL_OK")
</pallas_src>

<mosaic_0001>
module attributes {stable_mosaic.version = 11 : i64} {
  func.func @policy_net_kernel(%arg0: i32, %arg1: memref<8x8xf32, #tpu.memory_space<vmem>>, %arg2: memref<272x128xf32, #tpu.memory_space<vmem>>, %arg3: memref<8x128xf32, #tpu.memory_space<vmem>>) attributes {dimension_semantics = [#tpu.dimension_semantics<parallel>], iteration_bounds = array<i64: 1>, scalar_prefetch = 0 : i64, scratch_operands = 0 : i64, tpu.core_type = #tpu.core_type<tc>, window_params = [{transform_indices = @transform_0, window_bounds = array<i64: 8, 8>}, {pipeline_mode = #tpu.pipeline_mode<synchronous>, transform_indices = @transform_1, window_bounds = array<i64: 272, 128>}, {transform_indices = @transform_2, window_bounds = array<i64: 8, 128>}]} {
    %c0 = arith.constant 0 : index
    %c0_0 = arith.constant 0 : index
    %0 = vector.load %arg1[%c0, %c0_0] : memref<8x8xf32, #tpu.memory_space<vmem>>, vector<8x8xf32>
    %c0_1 = arith.constant 0 : index
    %c0_2 = arith.constant 0 : index
    %1 = vector.load %arg2[%c0_1, %c0_2] : memref<272x128xf32, #tpu.memory_space<vmem>>, vector<8x128xf32>
    %c8 = arith.constant 8 : index
    %c0_3 = arith.constant 0 : index
    %2 = vector.load %arg2[%c8, %c0_3] : memref<272x128xf32, #tpu.memory_space<vmem>>, vector<128x128xf32>
    %c136 = arith.constant 136 : index
    %c0_4 = arith.constant 0 : index
    %3 = vector.load %arg2[%c136, %c0_4] : memref<272x128xf32, #tpu.memory_space<vmem>>, vector<128x128xf32>
    %c264 = arith.constant 264 : index
    %c0_5 = arith.constant 0 : index
    %4 = vector.load %arg2[%c264, %c0_5] : memref<272x128xf32, #tpu.memory_space<vmem>>, vector<1x128xf32>
    %c265 = arith.constant 265 : index
    %c0_6 = arith.constant 0 : index
    %5 = vector.load %arg2[%c265, %c0_6] : memref<272x128xf32, #tpu.memory_space<vmem>>, vector<1x128xf32>
    %c266 = arith.constant 266 : index
    %c0_7 = arith.constant 0 : index
    %6 = vector.load %arg2[%c266, %c0_7] : memref<272x128xf32, #tpu.memory_space<vmem>>, vector<1x128xf32>
    %cst = arith.constant dense<0.000000e+00> : vector<8x128xf32>
    %7 = tpu.matmul %0, %1, %cst {dimension_numbers = #tpu.dot_dimension_numbers<[1], [0], [0], [1], [0, 0, 1, 1], [], []>} : vector<8x8xf32>, vector<8x128xf32>, vector<8x128xf32> -> vector<8x128xf32>
    %8 = vector.broadcast %4 : vector<1x128xf32> to vector<8x128xf32>
    %9 = arith.addf %7, %8 : vector<8x128xf32>
    %cst_8 = arith.constant 0.000000e+00 : f32
    %10 = vector.broadcast %cst_8 : f32 to vector<8x128xf32>
    %11 = arith.maximumf %9, %10 : vector<8x128xf32>
    %cst_9 = arith.constant dense<0.000000e+00> : vector<8x128xf32>
    %12 = tpu.matmul %11, %2, %cst_9 {dimension_numbers = #tpu.dot_dimension_numbers<[1], [0], [0], [1], [0, 0, 1, 1], [], []>} : vector<8x128xf32>, vector<128x128xf32>, vector<8x128xf32> -> vector<8x128xf32>
    %13 = vector.broadcast %5 : vector<1x128xf32> to vector<8x128xf32>
    %14 = arith.addf %12, %13 : vector<8x128xf32>
    %cst_10 = arith.constant 0.000000e+00 : f32
    %15 = vector.broadcast %cst_10 : f32 to vector<8x128xf32>
    %16 = arith.maximumf %14, %15 : vector<8x128xf32>
    %cst_11 = arith.constant dense<0.000000e+00> : vector<8x128xf32>
    %17 = tpu.matmul %16, %3, %cst_11 {dimension_numbers = #tpu.dot_dimension_numbers<[1], [0], [0], [1], [0, 0, 1, 1], [], []>} : vector<8x128xf32>, vector<128x128xf32>, vector<8x128xf32> -> vector<8x128xf32>
    %18 = vector.broadcast %6 : vector<1x128xf32> to vector<8x128xf32>
    %19 = arith.addf %17, %18 : vector<8x128xf32>
    %20 = tpu.iota {dimensions = array<i32: 1>} : vector<8x128xi32>
    %c2_i32 = arith.constant 2 : i32
    %21 = vector.broadcast %c2_i32 : i32 to vector<8x128xi32>
    %22 = arith.cmpi slt, %20, %21 : vector<8x128xi32>
    %cst_12 = arith.constant 0xFF800000 : f32
    %23 = vector.broadcast %cst_12 : f32 to vector<8x128xf32>
    %24 = arith.select %22, %19, %23 : vector<8x128xi1>, vector<8x128xf32>
    %cst_13 = arith.constant dense<0xFF800000> : vector<8xf32>
    %25 = vector.multi_reduction <maximumf>, %24, %cst_13 [1] : vector<8x128xf32> to vector<8xf32>
    %26 = vector.shape_cast %25 : vector<8xf32> to vector<8x1xf32>
    %27 = vector.broadcast %26 : vector<8x1xf32> to vector<8x128xf32>
    %28 = arith.subf %24, %27 : vector<8x128xf32>
    %29 = math.exp %28 : vector<8x128xf32>
    %cst_14 = arith.constant dense<0.000000e+00> : vector<8xf32>
    %30 = vector.multi_reduction <add>, %29, %cst_14 [1] : vector<8x128xf32> to vector<8xf32>
    %31 = vector.shape_cast %30 : vector<8xf32> to vector<8x1xf32>
    %32 = tpu.reciprocal %31 : vector<8x1xf32> -> vector<8x1xf32>
    %33 = vector.broadcast %32 : vector<8x1xf32> to vector<8x128xf32>
    %34 = arith.mulf %29, %33 : vector<8x128xf32>
    %c2_i32_15 = arith.constant 2 : i32
    %35 = vector.broadcast %c2_i32_15 : i32 to vector<8x128xi32>
    %36 = arith.cmpi eq, %20, %35 : vector<8x128xi32>
    %37 = arith.select %36, %19, %34 : vector<8x128xi1>, vector<8x128xf32>
    %c0_16 = arith.constant 0 : index
    %c0_17 = arith.constant 0 : index
    %38 = vector.load %arg3[%c0_16, %c0_17] : memref<8x128xf32, #tpu.memory_space<vmem>>, vector<8x128xf32>
    tpu.vector_store %arg3[%c0_16, %c0_17], %37 {strides = array<i32>} : memref<8x128xf32, #tpu.memory_space<vmem>>, vector<8x128xf32>,
    return
  }
  func.func @transform_0(%arg0: i32) -> (i32, i32) {
    %c0_i32 = arith.constant 0 : i32
    %c0_i32_0 = arith.constant 0 : i32
    return %arg0, %c0_i32 : i32, i32
  }
  func.func @transform_1(%arg0: i32) -> (i32, i32) {
    %c0_i32 = arith.constant 0 : i32
    %c0_i32_0 = arith.constant 0 : i32
    %c0_i32_1 = arith.constant 0 : i32
    return %c0_i32, %c0_i32_0 : i32, i32
  }
  func.func @transform_2(%arg0: i32) -> (i32, i32) {
    %c0_i32 = arith.constant 0 : i32
    %c0_i32_0 = arith.constant 0 : i32
    return %arg0, %c0_i32 : i32, i32
  }
}

</mosaic_0001>

<bundles_post_ra>
// kernel: tpu_custom_call.1
= control target key start
LH: loop header
LB: loop body
LE: loop exit
PB: predicated region body
PF: predicated region fallthrough
CT: control target
= control target key end

     0   :  { %7 = vsyncpa [#allocation3], 0  ;;  %s315_s0 = inlined_call_operand.hbm [shape: f32[8,8], index: 0, kind: input, shape index: {}]   ;;  %s316_s1 = inlined_call_operand.hbm [shape: f32[272,128], index: 1, kind: input, shape index: {}]   ;;  %s317_s2 = inlined_call_operand.hbm [shape: f32[8,128], index: 2, kind: output, shape index: {}]  }
   0x1   :  { %8 = vsyncpa [#allocation6], 0 }
   0x2   :  { %9 = vsyncpa [#allocation4], 0  ;;  %s15_s11 = sshll.u32 %s315_s0, 4  ;;  %s286_s12 = smov [#allocation2]   ;;  %s16_s11 = int_to_ptr.hbm [resolvable:$true] %s15_s11 }
   0x3   :  { %s17_s13 = sshll.u32 %s286_s12, 4  ;;  %s25_s16 = sshll.u32 %s316_s1, 4  ;;  %s18_s13 = int_to_ptr.vmem [resolvable:$true] %s17_s13  ;;  %s26_s16 = int_to_ptr.hbm [resolvable:$true] %s25_s16 }
   0x4   :  { %20 = dma.hbm_to_vmem [thread:$0]  %s16_s11, 128, %s18_s13, [#allocation3]  }
   0x5   :  { %s287_s17 = smov [#allocation5]   ;;  %s288_s19 = smov 128  }
   0x6   :  { %s27_s18 = sshll.u32 %s287_s17, 4  ;;  %s289_s20 = smov 8   ;;  %s28_s18 = int_to_ptr.vmem [resolvable:$true] %s27_s18 }
   0x7   :  { %33 = dma.hbm_to_vmem [thread:$0]  %s26_s16, 4352, %s28_s18, [#allocation6], %s288_s19, %s288_s19, %s289_s20  }
   0x8   :  { %280 = dma.done.wait [#allocation3], 128  }
   0x9   :  { %281 = vsyncadd [#allocation3], 4294967168 }
   0xa   :  { %282 = dma.done.wait [#allocation6], 4352  }
   0xb   :  { %283 = vsyncadd [#allocation6], 4294962944  ;;  %vm80_vm0 = vcmask 64512   ;;  %v43_v0 = vld [vmem:[#allocation5] sm:$0xff]  ;;  %v42_v1 = vld [vmem:[#allocation2] sm:$0xff]  ;;  %v148_v42 = vlaneseq  ;;  %s290_s0 = smov [#allocation7]  }
   0xc   :  { %v59_v2 = vld [vmem:[#allocation5 + $0x80] sm:$0xff]  ;;  %99 = vmatpush.msra.mxu0 %v43_v0  ;;  %v58_v3 = vld [vmem:[#allocation5 + $0x78] sm:$0xff]  ;;  %v57_v4 = vld [vmem:[#allocation5 + $0x70] sm:$0xff]  ;;  %s182_s1 = sshll.u32 %s290_s0, 4  ;;  %s184_s23 = sshll.u32 %s317_s2, 4  ;;  %s183_s1 = int_to_ptr.vmem [resolvable:$true] %s182_s1  ;;  %s185_s23 = int_to_ptr.hbm [resolvable:$true] %s184_s23 }
   0xd   :  { %106 = vmatpush.msra.mxu1 %v59_v2  ;;  %195 = vmatmul.msk.f32.vlgmr.msra.gmra.mxu0 %vm80_vm0, %v42_v1  ;;  %v56_v5 = vld [vmem:[#allocation5 + $0x68] sm:$0xff]  ;;  %v55_v6 = vld [vmem:[#allocation5 + $0x60] sm:$0xff]  ;;  %v54_v7 = vld [vmem:[#allocation5 + $0x58] sm:$0xff]  ;;  %v149_v43 = vand.u32 127, %v148_v42 }
   0xe   :  { %v53_v8 = vld [vmem:[#allocation5 + $0x50] sm:$0xff]  ;;  %v52_v9 = vld [vmem:[#allocation5 + $0x48] sm:$0xff]  ;;  %v51_v10 = vld [vmem:[#allocation5 + $0x40] sm:$0xff] }
   0xf   :  { %107 = vmatpush.msra.mxu1 %v58_v3  ;;  %v50_v11 = vld [vmem:[#allocation5 + $0x38] sm:$0xff]  ;;  %v49_v12 = vld [vmem:[#allocation5 + $0x30] sm:$0xff]  ;;  %v48_v13 = vld [vmem:[#allocation5 + $0x28] sm:$0xff]  ;;  %vm150_vm1 = vcmp.lt.s32.totalorder %v149_v43, 2  ;;  %vm174_vm6 = vcmp.eq.s32.totalorder %v149_v43, 2 }
  0x10   :  { %v47_v14 = vld [vmem:[#allocation5 + $0x20] sm:$0xff]  ;;  %v46_v15 = vld [vmem:[#allocation5 + $0x18] sm:$0xff]  ;;  %v45_v16 = vld [vmem:[#allocation5 + $0x10] sm:$0xff] }
  0x11   :  { %108 = vmatpush.msra.mxu1 %v57_v4  ;;  %v44_v17 = vld [vmem:[#allocation5 + $0x8] sm:$0xff]  ;;  %v75_v18 = vld [vmem:[#allocation5 + $0x100] sm:$0xff]  ;;  %v74_v19 = vld [vmem:[#allocation5 + $0xf8] sm:$0xff] }
  0x12   :  { %128 = vmatpush.msra.mxu2 %v75_v18  ;;  %v73_v20 = vld [vmem:[#allocation5 + $0xf0] sm:$0xff]  ;;  %v72_v21 = vld [vmem:[#allocation5 + $0xe8] sm:$0xff]  ;;  %v71_v22 = vld [vmem:[#allocation5 + $0xe0] sm:$0xff] }
  0x13   :  { %109 = vmatpush.msra.mxu1 %v56_v5  ;;  %v70_v23 = vld [vmem:[#allocation5 + $0xd8] sm:$0xff]  ;;  %v69_v24 = vld [vmem:[#allocation5 + $0xd0] sm:$0xff]  ;;  %v68_v25 = vld [vmem:[#allocation5 + $0xc8] sm:$0xff] }
  0x14   :  { %129 = vmatpush.msra.mxu2 %v74_v19  ;;  %v67_v26 = vld [vmem:[#allocation5 + $0xc0] sm:$0xff]  ;;  %v66_v27 = vld [vmem:[#allocation5 + $0xb8] sm:$0xff]  ;;  %v65_v28 = vld [vmem:[#allocation5 + $0xb0] sm:$0xff] }
  0x15   :  { %110 = vmatpush.msra.mxu1 %v55_v6  ;;  %v64_v29 = vld [vmem:[#allocation5 + $0xa8] sm:$0xff]  ;;  %v63_v30 = vld [vmem:[#allocation5 + $0xa0] sm:$0xff]  ;;  %v62_v35 = vld [vmem:[#allocation5 + $0x98] sm:$0xff] }
  0x16   :  { %130 = vmatpush.msra.mxu2 %v73_v20  ;;  %v201_v31 = vld [vmem:[#allocation5 + $0x108] ss:$0 sm:$0xff]  ;;  %v61_v36 = vld [vmem:[#allocation5 + $0x90] sm:$0xff]  ;;  %v202_v38 = vld [vmem:[#allocation5 + $0x109] ss:$0 sm:$0xff] }
  0x17   :  { %111 = vmatpush.msra.mxu1 %v54_v7  ;;  %v60_v37 = vld [vmem:[#allocation5 + $0x88] sm:$0xff] }
  0x18   :  { %131 = vmatpush.msra.mxu2 %v72_v21  ;;  %v203_v44 = vld [vmem:[#allocation5 + $0x10a] ss:$0 sm:$0xff] }
  0x19   :  { %112 = vmatpush.msra.mxu1 %v53_v8 }
  0x1a   :  { %132 = vmatpush.msra.mxu2 %v71_v22 }
  0x1b   :  { %113 = vmatpush.msra.mxu1 %v52_v9 }
  0x1c   :  { %133 = vmatpush.msra.mxu2 %v70_v23 }
  0x1d   :  { %114 = vmatpush.msra.mxu1 %v51_v10 }
  0x1e   :  { %134 = vmatpush.msra.mxu2 %v69_v24 }
  0x1f   :  { %115 = vmatpush.msra.mxu1 %v50_v11 }
  0x20   :  { %135 = vmatpush.msra.mxu2 %v68_v25 }
  0x21   :  { %116 = vmatpush.msra.mxu1 %v49_v12 }
  0x22   :  { %136 = vmatpush.msra.mxu2 %v67_v26 }
  0x23   :  { %117 = vmatpush.msra.mxu1 %v48_v13 }
  0x24   :  { %137 = vmatpush.msra.mxu2 %v66_v27 }
  0x25   :  { %118 = vmatpush.msra.mxu1 %v47_v14 }
  0x26   :  { %138 = vmatpush.msra.mxu2 %v65_v28 }
  0x27   :  { %119 = vmatpush.msra.mxu1 %v46_v15 }
  0x28   :  { %139 = vmatpush.msra.mxu2 %v64_v29 }
  0x29   :  { %120 = vmatpush.msra.mxu1 %v45_v16 }
  0x2a   :  { %140 = vmatpush.msra.mxu2 %v63_v30 }
  0x2b   :  { %121 = vmatpush.msra.mxu1 %v44_v17 }
  0x2c   :  { %141 = vmatpush.msra.mxu2 %v62_v35 }
  0x2e   :  { %142 = vmatpush.msra.mxu2 %v61_v36 }
  0x30   :  { %143 = vmatpush.msra.mxu2 %v60_v37 }
  0x8a   :  { %v101_v32 = vpop.f32.mrf.mxu0 }
  0x8b   :  { %v102_v33 = vadd.f32 %v201_v31, %v101_v32 }
  0x8d   :  { %v104_v34 = vmax.f32 %v102_v33, 0.0 }
  0x8f   :  { %122 = vmatmul.f32.vlgmr.msra.gmra.mxu1 %v104_v34 }
 0x10c   :  { %v123_v39 = vpop.f32.mrf.mxu1 }
 0x10d   :  { %v124_v40 = vadd.f32 %v202_v38, %v123_v39 }
 0x10f   :  { %v126_v41 = vmax.f32 %v124_v40, 0.0 }
 0x111   :  { %144 = vmatmul.f32.vlgmr.msra.gmra.mxu2 %v126_v41 }
 0x194   :  { %v145_v45 = vpop.f32.mrf.mxu2 }
 0x195   :  { %v146_v46 = vadd.f32 %v203_v44, %v145_v45 }
 0x197   :  { %v151_v47 = vsel %vm150_vm1, %v146_v46, -inf }
 0x198   :  { %152 = vmax.xlane.f32.xlu0 %v151_v47 }
 0x20b   :  { %v153_v48 = vpop.xlane.xlu0 %152 }
 0x20c   :  { %v154_v49 = vsub.f32 %v151_v47, %v153_v48 }
 0x20e   :  { %v155_v50 = vmul.f32 1.442695, %v154_v49 }
 0x210   :  { %204 = vpow2.f32 %v155_v50 }
 0x216   :  { %v205_v51 = vpop.eup %204 }
 0x217   :  { %157 = vadd.xlane.f32.xlu0 %v205_v51 }
 0x28a   :  { %v158_v52 = vpop.xlane.xlu0 %157 }
 0x28b   :  { %206 = vrcp.f32 %v158_v52  ;;  %v170_v56 = vand.u32 2147483648, %v158_v52  ;;  %v168_v58 = vand.u32 2147483647, %v158_v52  ;;  %vm164_vm3 = vweird.f32 %v158_v52 }
 0x28d   :  { %v171_v60 = vor.u32 1.1754944e-38, %v170_v56  ;;  %vm169_vm5 = vcmp.eq.f32.partialorder %v168_v58, 8.507059e+37 }
 0x291   :  { %v207_v53 = vpop.eup %206 }
 0x292   :  { %v160_v54 = vmul.f32 %v207_v53, %v158_v52  ;;  %vm165_vm2 = vweird.f32 %v207_v53 }
 0x293   :  { %vm166_vm4 = vmor %vm164_vm3, %vm165_vm2 }
 0x294   :  { %v161_v55 = vsub.f32 1.0, %v160_v54 }
 0x296   :  { %v162_v57 = vmul.f32 %v207_v53, %v161_v55 }
 0x298   :  { %v163_v59 = vadd.f32 %v207_v53, %v162_v57 }
 0x29a   :  { %v167_v61 = vsel %vm166_vm4, %v207_v53, %v163_v59 }
 0x29b   :  { %v172_v62 = vsel %vm169_vm5, %v171_v60, %v167_v61 }
 0x29c   :  { %v173_v63 = vmul.f32 %v205_v51, %v172_v62 }
 0x29e   :  { %v175_v0 = vsel %vm174_vm6, %v146_v46, %v173_v63 }
 0x29f   :  { %176 = vst [vmem:[#allocation7] sm:$0xff] %v175_v0 }
 0x2a0   :  { %187 = dma.vmem_to_hbm [thread:$0]  %s183_s1, 128, %s185_s23, [#allocation4]  }
 0x2a1   :  { %284 = dma.done.wait [#allocation4], 128  }
 0x2a2   :  { %285 = vsyncadd [#allocation4], 4294967168 }
 0x2a3   :  { %192 = vsyncpa [#allocation3], 1 }
 0x2a4   :  { %193 = vsyncpa [#allocation6], 1 }
 0x2a5   :  { %194 = vsyncpa [#allocation4], 1 }

</bundles_post_ra>
